<compile_context>
chip_gen: v5e
topology: v5e:2x2
jax: 0.10.0
libtpu: 0.0.40
codegen_flags: <defaults>
</compile_context>

<pallas_src>
import jax
import jax.numpy as jnp
from jax.experimental import pallas as pl
from jax.experimental.pallas import tpu as pltpu


def _round_up(x, m):
    return ((x + m - 1) // m) * m


# ---------------------------------------------------------------------------
# Kernel
# ---------------------------------------------------------------------------
def fc_kernel(x_ref, w_ref, b_ref, o_ref):
    # x_ref: (tm, tk) f32 activation tile (cast to bf16 in-kernel, free on VPU)
    # w_ref: (tk, tn) bf16 weight tile, canonical (K, N) orientation
    # b_ref: (1,  tn) f32 bias tile, resident across the K axis
    # o_ref: (tm, tn) f32 output tile == accumulator (resident across K:
    #        its index_map ignores k)
    k = pl.program_id(2)

    @pl.when(k == 0)
    def _():
        o_ref[...] = jnp.zeros_like(o_ref)

    # Single bf16 MXU pass, f32 accumulation.
    o_ref[...] += jnp.dot(
        x_ref[...].astype(jnp.bfloat16),
        w_ref[...],
        preferred_element_type=jnp.float32,
    )

    @pl.when(k == pl.num_programs(2) - 1)
    def _():
        # Dropout(p=0) is the identity (and identity in eval mode anyway).
        # TODO(synk): training-mode dropout with p>0 would need pltpu.prng_seed
        # + pltpu.prng_random_bits masking.
        o_ref[...] = jnp.maximum(o_ref[...] + b_ref[...], 0.0)


# ---------------------------------------------------------------------------
# Tile / VMEM budgeting
# ---------------------------------------------------------------------------
def _choose_tiles(batch_hint, out_features, in_features, tm_cap, tn_cap, tk_cap):
    Mp_min = _round_up(max(int(batch_hint), 1), 8)
    Np_min = _round_up(out_features, 128)
    Kp_min = _round_up(in_features, 128)

    # K: cover the whole (padded) reduction with one tile whenever it fits the
    # cap -> the K grid axis collapses to 1 and the init/epilogue run once.
    n_k = pl.cdiv(Kp_min, tk_cap)
    tk = _round_up(pl.cdiv(Kp_min, n_k), 128)

    n_n = pl.cdiv(Np_min, tn_cap)
    tn = _round_up(pl.cdiv(Np_min, n_n), 128)

    n_m = pl.cdiv(Mp_min, tm_cap)
    tm = _round_up(pl.cdiv(Mp_min, n_m), 8)

    # Megacore (and v7x's 2 TensorCores): make sure there are >= 2 parallel
    # (M x N) tiles when the problem can be split, so no core sits idle.
    if pl.cdiv(Mp_min, tm) * pl.cdiv(Np_min, tn) < 2:
        if Np_min >= 256:
            tn = _round_up(pl.cdiv(Np_min, 2), 128)
        elif Mp_min >= 16:
            tm = _round_up(pl.cdiv(Mp_min, 2), 8)

    return tm, tn, tk


def _vmem_limit_bytes(tm, tn, tk):
    # Double-buffered streams: x (f32), weight (bf16), bias (f32); output block
    # (f32) doubles as the accumulator.
    needed = (2 * tm * tk * 4          # x tiles
              + 2 * tk * tn * 2        # weight tiles (bf16)
              + 2 * tn * 4             # bias tiles
              + 2 * tm * tn * 4)       # output/accumulator tiles
    limit = max(32 * 1024 * 1024, needed + 16 * 1024 * 1024)
    # Conservative cap that always fits v7x's 64 MiB physical VMEM; raised on
    # chips with more VMEM (v5e/v6e: 128 MiB) when the query is available.
    cap = 48 * 1024 * 1024
    try:
        cap = max(cap, int(pltpu.get_tpu_info().vmem_capacity_bytes) * 3 // 4)
    except Exception:
        pass
    return min(limit, cap)


# ---------------------------------------------------------------------------
# Wrapper: one-time param prep (hoisted out of hot path) + per-call kernel
# ---------------------------------------------------------------------------
def make_fully_connected(weight, bias, *, batch_hint=128,
                         tm=512, tn=512, tk=2048):
    """Build relu(x @ weight.T + bias) for PyTorch nn.Linear params.

    weight: (out_features, in_features)   PyTorch layout
    bias:   (out_features,)

    Padding, transpose to canonical (K, N) and bf16 cast of the weight happen
    ONCE here (setup), not per call.
    """
    out_features, in_features = weight.shape
    assert bias.shape == (out_features,)

    tm, tn, tk = _choose_tiles(batch_hint, out_features, in_features, tm, tn, tk)
    Np = _round_up(out_features, tn)
    Kp = _round_up(in_features, tk)

    # One-time prep: pad -> transpose to (Kp, Np) -> bf16. Padded K rows are
    # zero (contribute nothing); padded N columns are sliced off after the call.
    w_t = jnp.pad(weight.astype(jnp.float32),
                  ((0, Np - out_features), (0, Kp - in_features))
                  ).T.astype(jnp.bfloat16)                       # (Kp, Np)
    b_p = jnp.pad(bias.astype(jnp.float32),
                  (0, Np - out_features)).reshape(1, Np)          # (1, Np)

    vmem_limit = _vmem_limit_bytes(tm, tn, tk)

    def fc(x):
        B, cin = x.shape
        assert cin == in_features, "weight/input feature mismatch"
        Mp = _round_up(B, tm)
        x_p = x if (Mp == B and Kp == in_features) else jnp.pad(
            x, ((0, Mp - B), (0, Kp - in_features)))

        grid = (Mp // tm, Np // tn, Kp // tk)

        out = pl.pallas_call(
            fc_kernel,
            out_shape=jax.ShapeDtypeStruct((Mp, Np), jnp.float32),
            grid_spec=pltpu.PrefetchScalarGridSpec(
                num_scalar_prefetch=0,
                grid=grid,
                in_specs=[
                    pl.BlockSpec((tm, tk), lambda i, j, k: (i, k)),  # x
                    pl.BlockSpec((tk, tn), lambda i, j, k: (k, j)),  # weight (K,N)
                    pl.BlockSpec((1, tn), lambda i, j, k: (0, j)),   # bias
                ],
                out_specs=pl.BlockSpec((tm, tn), lambda i, j, k: (i, j)),
            ),
            compiler_params=pltpu.CompilerParams(
                dimension_semantics=("parallel", "parallel", "arbitrary"),
                vmem_limit_bytes=vmem_limit,
            ),
        )(x_p, w_t, b_p)

        if Mp == B and Np == out_features:
            return out
        return out[:B, :out_features]

    return jax.jit(fc)


def fully_connected(x, weight, bias, **tile_kwargs):
    """Convenience one-shot call (param prep NOT hoisted — prefer the factory)."""
    return make_fully_connected(weight, bias,
                                batch_hint=x.shape[0], **tile_kwargs)(x)


def init_params(key, in_channels, out_channels):
    # Deterministic PyTorch-style nn.Linear init: U(-1/sqrt(in), 1/sqrt(in))
    kw, kb = jax.random.split(key)
    bound = 1.0 / jnp.sqrt(jnp.float32(in_channels))
    weight = jax.random.uniform(
        kw, (out_channels, in_channels), jnp.float32, -bound, bound)
    bias = jax.random.uniform(
        kb, (out_channels,), jnp.float32, -bound, bound)
    return weight, bias


if __name__ == "__main__":
    key = jax.random.PRNGKey(0)
    kx, kp = jax.random.split(key)

    # Small but non-trivial: exercises N padding (192 -> 256), the >=2-parallel-
    # tile split, and (in the second call) the multi-step K reduction path.
    batch, in_channels, out_channels = 16, 256, 192
    x = jax.random.normal(kx, (batch, in_channels), jnp.float32)
    weight, bias = init_params(kp, in_channels, out_channels)

    # 1) Default tiles: K axis collapses to a single step, 2 parallel N tiles.
    fc = make_fully_connected(weight, bias, batch_hint=batch)
    out = jax.block_until_ready(fc(x))

    # 2) Forced small tiles: exercises the K-reduction accumulate-into-output
    #    path (grid (2, 2, 2)).
    fc_small = make_fully_connected(weight, bias, batch_hint=batch,
                                    tm=8, tn=128, tk=128)
    out_small = jax.block_until_ready(fc_small(x))

    # Reference check (f32 reference; kernel uses bf16 inputs with f32
    # accumulation, so tolerance is bf16-level).
    ref = jnp.maximum(x @ weight.T + bias, 0.0)
    assert out.shape == (batch, out_channels)
    assert out_small.shape == (batch, out_channels)
    assert jnp.allclose(out, ref, atol=3e-2, rtol=3e-2)
    assert jnp.allclose(out_small, ref, atol=3e-2, rtol=3e-2)
    # Both kernel paths accumulate in f32 -> should agree tightly.
    assert jnp.allclose(out, out_small, atol=1e-3, rtol=1e-3)

    print("KERNEL_OK")
</pallas_src>

<mosaic_0001>
module attributes {stable_mosaic.version = 11 : i64} {
  func.func @fc_kernel(%arg0: i32, %arg1: i32, %arg2: i32, %arg3: memref<16x256xf32, #tpu.memory_space<vmem>>, %arg4: memref<256x128xbf16, #tpu.memory_space<vmem>>, %arg5: memref<1x128xf32, #tpu.memory_space<vmem>>, %arg6: memref<16x128xf32, #tpu.memory_space<vmem>>) attributes {dimension_semantics = [#tpu.dimension_semantics<parallel>, #tpu.dimension_semantics<parallel>, #tpu.dimension_semantics<arbitrary>], iteration_bounds = array<i64: 1, 2, 1>, scalar_prefetch = 0 : i64, scratch_operands = 0 : i64, tpu.core_type = #tpu.core_type<tc>, window_params = [{transform_indices = @transform_0, window_bounds = array<i64: 16, 256>}, {transform_indices = @transform_1, window_bounds = array<i64: 256, 128>}, {transform_indices = @transform_2, window_bounds = array<i64: 1, 128>}, {transform_indices = @transform_3, window_bounds = array<i64: 16, 128>}]} {
    %c0_i32 = arith.constant 0 : i32
    %0 = arith.cmpi eq, %arg2, %c0_i32 : i32
    %1 = arith.extui %0 : i1 to i32
    %c0_i32_0 = arith.constant 0 : i32
    %2 = arith.cmpi ne, %1, %c0_i32_0 : i32
    scf.if %2 {
      %cst_10 = arith.constant 0.000000e+00 : f32
      %13 = vector.broadcast %cst_10 : f32 to vector<16x128xf32>
      %c0_11 = arith.constant 0 : index
      %c0_12 = arith.constant 0 : index
      %14 = vector.load %arg6[%c0_11, %c0_12] : memref<16x128xf32, #tpu.memory_space<vmem>>, vector<16x128xf32>
      tpu.vector_store %arg6[%c0_11, %c0_12], %13 {strides = array<i32>} : memref<16x128xf32, #tpu.memory_space<vmem>>, vector<16x128xf32>,
    } else {
    }
    %c0 = arith.constant 0 : index
    %c0_1 = arith.constant 0 : index
    %3 = vector.load %arg6[%c0, %c0_1] : memref<16x128xf32, #tpu.memory_space<vmem>>, vector<16x128xf32>
    %c0_2 = arith.constant 0 : index
    %c0_3 = arith.constant 0 : index
    %4 = vector.load %arg3[%c0_2, %c0_3] : memref<16x256xf32, #tpu.memory_space<vmem>>, vector<16x256xf32>
    %5 = arith.truncf %4 : vector<16x256xf32> to vector<16x256xbf16>
    %c0_4 = arith.constant 0 : index
    %c0_5 = arith.constant 0 : index
    %6 = vector.load %arg4[%c0_4, %c0_5] : memref<256x128xbf16, #tpu.memory_space<vmem>>, vector<256x128xbf16>
    %cst = arith.constant dense<0.000000e+00> : vector<16x128xf32>
    %7 = tpu.matmul %5, %6, %cst {dimension_numbers = #tpu.dot_dimension_numbers<[1], [0], [0], [1], [0, 0, 1, 1], [], []>} : vector<16x256xbf16>, vector<256x128xbf16>, vector<16x128xf32> -> vector<16x128xf32>
    %8 = arith.addf %3, %7 : vector<16x128xf32>
    %c0_6 = arith.constant 0 : index
    %c0_7 = arith.constant 0 : index
    %9 = vector.load %arg6[%c0_6, %c0_7] : memref<16x128xf32, #tpu.memory_space<vmem>>, vector<16x128xf32>
    tpu.vector_store %arg6[%c0_6, %c0_7], %8 {strides = array<i32>} : memref<16x128xf32, #tpu.memory_space<vmem>>, vector<16x128xf32>,
    %c0_i32_8 = arith.constant 0 : i32
    %10 = arith.cmpi eq, %arg2, %c0_i32_8 : i32
    %11 = arith.extui %10 : i1 to i32
    %c0_i32_9 = arith.constant 0 : i32
    %12 = arith.cmpi ne, %11, %c0_i32_9 : i32
    scf.if %12 {
      %c0_10 = arith.constant 0 : index
      %c0_11 = arith.constant 0 : index
      %13 = vector.load %arg6[%c0_10, %c0_11] : memref<16x128xf32, #tpu.memory_space<vmem>>, vector<16x128xf32>
      %c0_12 = arith.constant 0 : index
      %c0_13 = arith.constant 0 : index
      %14 = vector.load %arg5[%c0_12, %c0_13] : memref<1x128xf32, #tpu.memory_space<vmem>>, vector<1x128xf32>
      %15 = vector.broadcast %14 : vector<1x128xf32> to vector<16x128xf32>
      %16 = arith.addf %13, %15 : vector<16x128xf32>
      %cst_14 = arith.constant 0.000000e+00 : f32
      %17 = vector.broadcast %cst_14 : f32 to vector<16x128xf32>
      %18 = arith.maximumf %16, %17 : vector<16x128xf32>
      %c0_15 = arith.constant 0 : index
      %c0_16 = arith.constant 0 : index
      %19 = vector.load %arg6[%c0_15, %c0_16] : memref<16x128xf32, #tpu.memory_space<vmem>>, vector<16x128xf32>
      tpu.vector_store %arg6[%c0_15, %c0_16], %18 {strides = array<i32>} : memref<16x128xf32, #tpu.memory_space<vmem>>, vector<16x128xf32>,
    } else {
    }
    return
  }
  func.func @transform_0(%arg0: i32, %arg1: i32, %arg2: i32) -> (i32, i32) {
    %c0_i32 = arith.constant 0 : i32
    return %arg0, %arg2 : i32, i32
  }
  func.func @transform_1(%arg0: i32, %arg1: i32, %arg2: i32) -> (i32, i32) {
    %c0_i32 = arith.constant 0 : i32
    return %arg2, %arg1 : i32, i32
  }
  func.func @transform_2(%arg0: i32, %arg1: i32, %arg2: i32) -> (i32, i32) {
    %c0_i32 = arith.constant 0 : i32
    %c0_i32_0 = arith.constant 0 : i32
    return %c0_i32, %arg1 : i32, i32
  }
  func.func @transform_3(%arg0: i32, %arg1: i32, %arg2: i32) -> (i32, i32) {
    %c0_i32 = arith.constant 0 : i32
    return %arg0, %arg1 : i32, i32
  }
}

</mosaic_0001>

<bundles_post_ra>
// kernel: fc.1
= control target key start
LH: loop header
LB: loop body
LE: loop exit
PB: predicated region body
PF: predicated region fallthrough
CT: control target
= control target key end

     0   :  { %8 = vsyncpa [#allocation3], 0  ;;  %s1174_s0 = inlined_call_operand.hbm [shape: f32[16,256], index: 0, kind: input, shape index: {}]   ;;  %s1175_s1 = inlined_call_operand.hbm [shape: bf16[256,256], index: 1, kind: input, shape index: {}]   ;;  %s1176_s2 = inlined_call_operand.hbm [shape: f32[1,256], index: 2, kind: input, shape index: {}]   ;;  %s1177_s3 = inlined_call_operand.hbm [shape: f32[16,256], index: 3, kind: output, shape index: {}]  }
   0x1   :  { %9 = vsyncpa [#allocation6], 0 }
   0x2   :  { %11 = vsyncpa [#allocation6 + $0x1], 0 }
   0x3   :  { %12 = vsyncpa [#allocation4], 0 }
   0x4   :  { %14 = vsyncpa [#allocation4 + $0x1], 0  ;;  %s1000_s12 = smov 0   ;;  %s1002_s13 = smov 0  }
   0x5   :  { %s1004_s14 = smov 0   ;;  %s1006_s15 = smov 0  }
   0x6   :  { %s1008_s16 = smov 0   ;;  %s1010_s17 = smov 0  }
   0x7 LB: > { %s35_s18 = sadd.s32 1, %s965_s16  ;;  %s76_s19 = sadd.s32 1, %s957_s14  ;;  %s969_s17 = sphi %s1010_s17, %s20_s17   ;;  %s965_s16 = sphi %s1008_s16, %s1188_s16   ;;  %s961_s15 = sphi %s1006_s15, %s1187_s15   ;;  %s957_s14 = sphi %s1004_s14, %s1186_s14   ;;  %s953_s13 = sphi %s1002_s13, %s1185_s13   ;;  %s949_s12 = sphi %s1000_s12, %s1184_s12  }
   0x8   : > { %p37_p0 = scmp.ge.s32.totalorder %s35_s18, 2  ;;  %p83_p1 = scmp.ne.s32.totalorder %s957_s14, %s953_s13 }
   0x9   : > { %p84_p2 = scmp.eq.s32.totalorder %s969_s17, 0  ;;  %p614_p3 = scmp.ge.s32.totalorder %s969_s17, 2 }
   0xa   : > { %s1190_s18 = smov (%p37_p0, %s35_s18), 0  ;;  %p731_p5 = scmp.lt.s32.totalorder %s969_s17, 2 }
   0xb   : > { %p1041_p4 = por %p84_p2, %p83_p1  ;;  %s72_s21 = ssub.s32 %s965_s16, %s1190_s18 }
   0xc   : > { %s187_s22 = sand.u32 1, %s969_s17   ;;  %p74_p6 = scmp.eq.s32.totalorder %s72_s21, 0 }
   0xd   : > { %s189_s23 = sand.u32 1, %s957_s14   ;;  %s616_s24 = sshll.u32 %s965_s16, 2 }
   0xe   : > { %s1052_s25 = scalar_select %p74_p6, %s957_s14, %s76_s19  }
   0xf   : > { %s615_s26 = sshll.u32 %s189_s23, 7  ;;  %s198_s29 = scalar_lea.hbm %s1175_s1, %s616_s24 }
  0x10   : > { %s199_s30 = sshll.u32 %s198_s29, 4  ;;  %s191_s4 = scalar_lea.vmem [#allocation5], %s615_s26  ;;  %s200_s30 = int_to_ptr.hbm [resolvable:$true] %s199_s30 }
  0x11   : > { %s201_s5 = sshll.u32 %s191_s4, 4  ;;  %p1063_p7 = pnand %p731_p5, %p1041_p4  ;;  %s202_s5 = int_to_ptr.vmem [resolvable:$true] %s201_s5 }
  0x12   : > { %s1067_s7 = scalar_lea.sflag [#allocation6], %s187_s22  ;;  %s971_s8 = smov 128  }
  0x13   : > { %s972_s9 = smov 64   ;;  %s973_s10 = smov 4  }
  0x14   : > { %722 = dma.hbm_to_vmem [thread:$0]  (!%p1063_p7), %s200_s30, 2048, %s202_s5, %s1067_s7, %s971_s8, %s972_s9, %s973_s10  }
  0x15   : > { %s1073_s11 = sadd.s32 4294967295, %s969_s17   ;;  %s611_s19 = sadd.s32 4294967294, %s969_s17  }
  0x16   : > { %p89_p8 = scmp.ne.s32.totalorder %s953_s13, %s949_s12  ;;  %p90_p9 = scmp.eq.s32.totalorder %s1073_s11, 0 }
  0x17   : > { %p141_p10 = scmp.eq.s32.totalorder %s1073_s11, 1  ;;  %p147_p11 = scmp.eq.s32.totalorder %s611_s19, 1 }
  0x18   : > { %p1082_p12 = por %p90_p9, %p89_p8  ;;  %p612_p13 = scmp.ge.s32.totalorder %s969_s17, 1 }
  0x19   : > { %p1090_p0 = por %p141_p10, %p83_p1  ;;  %p1094_p2 = por %p147_p11, %p89_p8 }
  0x1a   : > { %p154_p4 = scmp.lt.s32.totalorder %s969_s17, 3  ;;  %s171_s27 = sshll.u32 %s1174_s0, 4  ;;  %s172_s27 = int_to_ptr.hbm [resolvable:$true] %s171_s27 }
  0x1b   : > { %s974_s29 = smov [#allocation2]   ;;  %s217_s8 = scalar_lea.hbm %s1176_s2, %s965_s16 }
  0x1c   : > { %p1102_p5 = pnand %p612_p13, %p154_p4  ;;  %s173_s30 = sshll.u32 %s974_s29, 4  ;;  %s174_s30 = int_to_ptr.vmem [resolvable:$true] %s173_s30 }
  0x1d   : > { %s219_s9 = sshll.u32 %s217_s8, 4  ;;  %s214_s10 = scalar_lea.vmem [#allocation7], %s189_s23  ;;  %s220_s9 = int_to_ptr.hbm [resolvable:$true] %s219_s9 }
  0x1e   : > { %p715_p1 = pneg %p1102_p5  ;;  %s221_s19 = sshll.u32 %s214_s10, 4  ;;  %s222_s19 = int_to_ptr.vmem [resolvable:$true] %s221_s19 }
  0x1f   : > { %s975_s24 = smov 256   ;;  %s976_s26 = smov 16  }
  0x20   : > { %p716_p6 = pnand %p715_p1, %p90_p9  ;;  %230 = sbr.rel (%p1102_p5) target bundleno = 220 (0xdc), region = 32 }
  0x21   : > { %725 = dma.hbm_to_vmem [thread:$0]  (!%p1063_p7), %s220_s9, 16, %s222_s19, %s1067_s7  }
  0x22   : > { %718 = dma.hbm_to_vmem [thread:$0]  (!%p716_p6), %s172_s27, 512, %s174_s30, [#allocation3], %s975_s24, %s975_s24, %s976_s26  }
  0x25   : > { %936 = dma.done.wait (%p90_p9), [#allocation3], 512  }
  0x26   : > { %938 = vsyncadd (%p90_p9), [#allocation3], 4294966784  ;;  %s237_s23 = sand.u32 1, %s1073_s11   ;;  %s1127_s29 = sand.u32 1, %s953_s13  }
  0x27   : > { %s619_s27 = sshll.u32 %s1127_s29, 7  ;;  %s238_s30 = scalar_lea.sflag [#allocation6], %s237_s23 }
  0x28   : > { %s241_s6 = scalar_lea.vmem [#allocation5], %s619_s27 }
  0x29   : > { %940 = dma.done.wait (%p1082_p12), %s238_s30, 2064  }
  0x2a   : > { %942 = vsyncadd (%p1082_p12), %s238_s30, 4294965232  ;;  %v696_v0 = vld [vmem:[%s241_s6 + $0x38] sm:$0xff]  ;;  %v695_v2 = vld [vmem:[%s241_s6 + $0x30] sm:$0xff]  ;;  %s250_s7 = scalar_lea.vmem [#allocation7], %s1127_s29  ;;  %s620_s11 = sshll.u32 %s1127_s29, 4 }
  0x2b   : > { %v704_v1 = vld [vmem:[%s241_s6 + $0x78] sm:$0xff]  ;;  %424 = vmatpush.bf16.msra.mxu0 %v696_v0  ;;  %v703_v3 = vld [vmem:[%s241_s6 + $0x70] sm:$0xff]  ;;  %v694_v4 = vld [vmem:[%s241_s6 + $0x28] sm:$0xff]  ;;  %s686_s20 = sshll.u32 %s961_s15, 3  ;;  %s277_s8 = scalar_lea.vmem [#allocation8], %s620_s11 }
  0x2c   : > { %438 = vmatpush.bf16.msra.mxu1 %v704_v1  ;;  %v702_v5 = vld [vmem:[%s241_s6 + $0x68] sm:$0xff]  ;;  %v693_v6 = vld [vmem:[%s241_s6 + $0x20] sm:$0xff]  ;;  %v692_v8 = vld [vmem:[%s241_s6 + $0x18] sm:$0xff]  ;;  %s485_s5 = scalar_lea.hbm %s1177_s3, %s686_s20  ;;  %s486_s9 = sshll.u32 %s277_s8, 4  ;;  %s487_s9 = int_to_ptr.vmem [resolvable:$true] %s486_s9 }
  0x2d   : > { %v701_v7 = vld [vmem:[%s241_s6 + $0x60] sm:$0xff]  ;;  %v700_v9 = vld [vmem:[%s241_s6 + $0x58] sm:$0xff]  ;;  %v691_v10 = vld [vmem:[%s241_s6 + $0x10] sm:$0xff]  ;;  %s488_s10 = sshll.u32 %s485_s5, 4  ;;  %s472_s19 = scalar_lea.sflag [#allocation4], %s1127_s29  ;;  %s489_s10 = int_to_ptr.hbm [resolvable:$true] %s488_s10 }
  0x2e   : > { %v699_v11 = vld [vmem:[%s241_s6 + $0x50] sm:$0xff]  ;;  %v690_v12 = vld [vmem:[%s241_s6 + $0x8] sm:$0xff]  ;;  %v689_v14 = vld [vmem:[%s241_s6] sm:$0xff]  ;;  %s897_s15 = sshra.s32 %s489_s10, 4  ;;  %s903_s27 = scalar_lea.hbm %s1177_s3, 32  ;;  %s898_s15 = int_to_ptr.hbm [resolvable:$true] %s897_s15 }
  0x2f   : > { %425 = vmatpush.bf16.msra.mxu0 %v695_v2  ;;  %v698_v13 = vld [vmem:[%s241_s6 + $0x48] sm:$0xff]  ;;  %v697_v15 = vld [vmem:[%s241_s6 + $0x40] sm:$0xff]  ;;  %v292_v17 = vld [vmem:[#allocation2 + $0x10] sm:$0xff]  ;;  %s899_s24 = scalar_lea.hbm %s898_s15, 16  ;;  %p904_p10 = scmp.lt.s32.totalorder %s898_s15, %s1177_s3 }
  0x30   : > { %439 = vmatpush.bf16.msra.mxu1 %v703_v3  ;;  %v290_v16 = vld [vmem:[#allocation2] sm:$0xff]  ;;  %v291_v18 = vld [vmem:[#allocation2 + $0x8] sm:$0xff]  ;;  %v293_v19 = vld [vmem:[#allocation2 + $0x18] sm:$0xff]  ;;  %p900_p7 = scmp.ne.s32.totalorder %s898_s15, %s899_s24  ;;  %p905_p11 = scmp.lt.s32.totalorder %s903_s27, %s899_s24 }
  0x31   : > { %v294_v20 = vpack.c.bf16 %v292_v17, %v290_v16  ;;  %v295_v21 = vpack.c.bf16 %v293_v19, %v291_v18  ;;  %v792_v25 = vld [vmem:[%s250_s7] ss:$0 sm:$0xff] }
  0x32   : > { %p901_p8 = pnand %p900_p7, %p1090_p0  ;;  %p906_p12 = por %p905_p11, %p904_p10 }
  0x33   : > { %426 = vmatpush.bf16.msra.mxu0 %v694_v4 }
  0x34   : > { %440 = vmatpush.bf16.msra.mxu1 %v702_v5  ;;  %p902_p9 = pneg %p901_p8 }
  0x36   : > { %p907_p13 = pnand %p906_p12, %p902_p9 }
  0x37   : > { %427 = vmatpush.bf16.msra.mxu0 %v693_v6 }
  0x38   : > { %441 = vmatpush.bf16.msra.mxu1 %v701_v7 }
  0x3b   : > { %428 = vmatpush.bf16.msra.mxu0 %v692_v8 }
  0x3c   : > { %442 = vmatpush.bf16.msra.mxu1 %v700_v9 }
  0x3f   : > { %429 = vmatpush.bf16.msra.mxu0 %v691_v10 }
  0x40   : > { %443 = vmatpush.bf16.msra.mxu1 %v699_v11 }
  0x43   : > { %430 = vmatpush.bf16.msra.mxu0 %v690_v12 }
  0x44   : > { %444 = vmatpush.bf16.msra.mxu1 %v698_v13 }
  0x47   : > { %431 = vmatpush.bf16.msra.mxu0 %v689_v14 }
  0x48   : > { %445 = vmatpush.bf16.msra.mxu1 %v697_v15 }
  0x4a   : > { %432 = vmatmul.bf16.vlgmr.msra.gmra.mxu0 %v294_v20 }
  0x4b   : > { %446 = vmatmul.bf16.vlgmr.msra.gmra.mxu1 %v295_v21 }
  0xc7   : > { %v433_v22 = vpop.f32.mrf.mxu0 }
  0xc8   : > { %v447_v23 = vpop.f32.mrf.mxu1 }
  0xc9   : > { %v448_v24 = vadd.f32 %v447_v23, %v433_v22 }
  0xcb   : > { %v465_v26 = vadd.f32 %v792_v25, %v448_v24 }
  0xcd   : > { %v467_v27 = vmax.f32 %v465_v26, 0.0 }
  0xcf   : > { %v435_v28 = vpop.f32.mrf.mxu0  ;;  %469 = vst [vmem:[%s277_s8] sm:$0xff] %v467_v27 }
  0xd0   : > { %v449_v29 = vpop.f32.mrf.mxu1 }
  0xd1   : > { %v450_v30 = vadd.f32 %v449_v29, %v435_v28 }
  0xd3   : > { %v466_v31 = vadd.f32 %v792_v25, %v450_v30 }
  0xd5   : > { %v468_v32 = vmax.f32 %v466_v31, 0.0 }
  0xd7   : > { %470 = vst [vmem:[%s277_s8 + $0x8] sm:$0xff] %v468_v32 }
  0xd8   : > { %910 = shalt.err (!%p907_p13)
}
  0xd9   : > { %s977_s29 = smov 128   ;;  %s978_s7 = smov 256  }
  0xda   : > { %s979_s11 = smov 8  }
  0xdb   : > { %713 = dma.vmem_to_hbm [thread:$0]  (%p1090_p0), %s487_s9, 256, %s489_s10, %s472_s19, %s977_s29, %s978_s7, %s979_s11  }
  0xdc PF: > { %s503_s20 = sand.u32 1, %s949_s12   ;;  %p727_p4 = pnand %p614_p3, %p1094_p2 }
  0xdd   : > { %s504_s28 = scalar_lea.sflag [#allocation4], %s503_s20 }
  0xde   : > { %p728_p5 = pneg %p727_p4 }
  0xe0   : > { %944 = dma.done.wait (%p728_p5), %s504_s28, 256  }
  0xe1   : > { %946 = vsyncadd (%p728_p5), %s504_s28, 4294967040  ;;  %s20_s17 = sadd.s32 1, %s969_s17   ;;  %s1184_s12 = smov %s953_s13 }
  0xe2   : > { %p17_p1 = scmp.ge.s32.totalorder %s20_s17, 4   ;;  %s1185_s13 = smov %s957_s14 }
  0xe3   : > { %s1186_s14 = smov %s1052_s25  ;;  %s1187_s15 = smov %s965_s16 }
  0xe4   : > { %s1188_s16 = smov %s1190_s18  ;;  %19 = sbr.rel (!%p17_p1) target bundleno = 7 (0x7), region = 102 }
  0xe9   :  { %510 = vsyncpa [#allocation3], 1 }
  0xea   :  { %512 = vsyncpa [#allocation3 + $0x1], 1 }
  0xeb   :  { %513 = vsyncpa [#allocation6], 1 }
  0xec   :  { %515 = vsyncpa [#allocation6 + $0x1], 1 }
  0xed   :  { %516 = vsyncpa [#allocation4], 1 }
  0xee   :  { %518 = vsyncpa [#allocation4 + $0x1], 1 }

</bundles_post_ra>
